<compile_context>
chip_gen: v7x
topology: tpu7x:2x2x1
jax: 0.10.0
libtpu: 0.0.40
codegen_flags: <defaults>
</compile_context>

<pallas_src>
import functools
import math

import jax
import jax.numpy as jnp
from jax.experimental import pallas as pl
from jax.experimental.pallas import tpu as pltpu


def _round_up(v: int, m: int) -> int:
    return ((v + m - 1) // m) * m


def gcn_agg_kernel(adj_ref, h_ref, o_ref):
    """out[i] += adj[i, k] @ H[k]  (bf16 MXU operands, f32 accumulation)."""
    k = pl.program_id(1)

    @pl.when(k == 0)
    def _():
        o_ref[...] = jnp.zeros_like(o_ref)

    o_ref[...] += jnp.dot(
        adj_ref[...].astype(jnp.bfloat16),   # int8 (or bf16) tile -> bf16 for MXU
        h_ref[...],
        preferred_element_type=jnp.float32,
    )


@functools.partial(jax.jit, static_argnames=("block_m", "block_k", "binary_adj"))
def graph_conv_layer(x, adj, weight, bias, *,
                     block_m: int = 512, block_k: int = 512,
                     binary_adj: bool = True):
    """x: (N, C_in), adj: (N, N), weight: (C_out, C_in), bias: (C_out,).
    Returns (1, N, C_out) float32, matching the PyTorch module.

    block_m / block_k must be multiples of 128.  binary_adj=True stores the
    adjacency as int8 in HBM (exact for 0/1 graphs); use binary_adj=False for
    weighted adjacencies (stored as bf16 instead)."""
    assert block_m % 128 == 0 and block_k % 128 == 0, \
        "block_m / block_k must be multiples of 128"

    n, c_in = x.shape
    c_out = weight.shape[0]
    c_out_p = _round_up(c_out, 128)
    n128 = _round_up(n, 128)

    # ---- tile selection --------------------------------------------------
    blk_m = max(128, min(block_m, n128))
    # Keep >= 2 row tiles when the graph allows it so v7x's two TensorCores
    # both get work on the "parallel" row-tile axis.
    while blk_m > 128 and 2 * blk_m > n128:
        blk_m = max(128, (blk_m // 2) // 128 * 128)
    blk_k = max(128, min(block_k, n128))
    n_p = _round_up(n, math.lcm(blk_m, blk_k))
    grid = (n_p // blk_m, n_p // blk_k)

    # ---- H = x @ W^T + b, hoisted out of the kernel (f32 math, bf16 store) -
    h = (x.astype(jnp.float32) @ weight.astype(jnp.float32).T
         + bias.astype(jnp.float32))                        # (n, c_out) f32
    h_b = h.astype(jnp.bfloat16)
    if (n_p, c_out_p) == (n, c_out):
        h_p = h_b
    else:
        h_p = jnp.zeros((n_p, c_out_p), jnp.bfloat16).at[:n, :c_out].set(h_b)

    # ---- adjacency: int8 (binary) or bf16 storage; repack only if needed --
    adj_dtype = jnp.int8 if binary_adj else jnp.bfloat16
    if n_p == n and adj.dtype == adj_dtype:
        adj_p = adj                       # caller already supplies packed adj
    else:
        adj_p = jnp.zeros((n_p, n_p), adj_dtype).at[:n, :n].set(
            adj.astype(adj_dtype))
    # (Padded adj rows/cols are zero and padded H rows are zero, so the padded
    #  region never contaminates real output rows; padding is sliced off.)

    # ---- block specs -------------------------------------------------------
    adj_kwargs = {}
    if grid[1] >= 3:                      # deeper pipeline on the adj stream
        adj_kwargs["pipeline_mode"] = pl.Buffered(3)
    adj_spec = pl.BlockSpec((blk_m, blk_k), lambda i, k: (i, k), **adj_kwargs)
    h_spec = pl.BlockSpec((blk_k, c_out_p), lambda i, k: (k, 0))
    out_spec = pl.BlockSpec((blk_m, c_out_p), lambda i, k: (i, 0))

    # Advisory cost hint: adj read once, H re-read once per row tile, out once.
    adj_bytes = jnp.dtype(adj_dtype).itemsize
    flops = 2 * n_p * n_p * c_out_p
    bytes_accessed = (n_p * n_p * adj_bytes
                      + grid[0] * n_p * c_out_p * 2
                      + n_p * c_out_p * 4)

    out = pl.pallas_call(
        gcn_agg_kernel,
        out_shape=jax.ShapeDtypeStruct((n_p, c_out_p), jnp.float32),
        grid_spec=pltpu.PrefetchScalarGridSpec(
            num_scalar_prefetch=0,
            grid=grid,
            in_specs=[adj_spec, h_spec],
            out_specs=out_spec,
        ),
        compiler_params=pltpu.CompilerParams(
            dimension_semantics=("parallel", "arbitrary")),
        cost_estimate=pl.CostEstimate(
            flops=int(flops), transcendentals=0,
            bytes_accessed=int(bytes_accessed)),
    )(adj_p, h_p)

    # Strip padding and add torch's unsqueeze(0) batch dim.
    return out[None, :n, :c_out]


if __name__ == "__main__":
    key = jax.random.PRNGKey(0)
    k_x, k_adj, k_w, k_b = jax.random.split(key, 4)

    N = 16          # number of graph nodes
    C_IN = 32       # in_channels
    C_OUT = 32      # out_channels

    x = jax.random.normal(k_x, (N, C_IN), dtype=jnp.float32)
    adj = (jax.random.uniform(k_adj, (N, N)) > 0.5).astype(jnp.float32)

    # Deterministic parameter init (shapes match nn.Linear(in, out)).
    bound = 1.0 / (C_IN ** 0.5)
    weight = jax.random.uniform(k_w, (C_OUT, C_IN), minval=-bound, maxval=bound,
                                dtype=jnp.float32)
    bias = jax.random.uniform(k_b, (C_OUT,), minval=-bound, maxval=bound,
                              dtype=jnp.float32)

    out = graph_conv_layer(x, adj, weight, bias)
    jax.block_until_ready(out)
    assert out.shape == (1, N, C_OUT)

    # Reference 1: exact f32 math (loose tolerance -- H is rounded to bf16
    # before the aggregation matmul inside the kernel).
    ref_f32 = adj @ (x @ weight.T + bias)
    assert jnp.allclose(out[0], ref_f32, atol=1e-1, rtol=1e-1)

    # Reference 2: apply the same bf16 rounding of H as the kernel (tight).
    h_ref = (x @ weight.T + bias).astype(jnp.bfloat16).astype(jnp.float32)
    ref_bf16 = adj @ h_ref
    assert jnp.allclose(out[0], ref_bf16, atol=1e-2, rtol=1e-2)

    print("KERNEL_OK")
</pallas_src>

<mosaic_0001>
module attributes {stable_mosaic.version = 11 : i64} {
  func.func @gcn_agg_kernel(%arg0: i32, %arg1: i32, %arg2: memref<128x128xi8, #tpu.memory_space<vmem>>, %arg3: memref<128x128xbf16, #tpu.memory_space<vmem>>, %arg4: memref<128x128xf32, #tpu.memory_space<vmem>>) attributes {dimension_semantics = [#tpu.dimension_semantics<parallel>, #tpu.dimension_semantics<arbitrary>], iteration_bounds = array<i64: 1, 1>, scalar_prefetch = 0 : i64, scratch_operands = 0 : i64, tpu.core_type = #tpu.core_type<tc>, window_params = [{transform_indices = @transform_0, window_bounds = array<i64: 128, 128>}, {transform_indices = @transform_1, window_bounds = array<i64: 128, 128>}, {transform_indices = @transform_2, window_bounds = array<i64: 128, 128>}]} {
    %c0_i32 = arith.constant 0 : i32
    %0 = arith.cmpi eq, %arg1, %c0_i32 : i32
    %1 = arith.extui %0 : i1 to i32
    %c0_i32_0 = arith.constant 0 : i32
    %2 = arith.cmpi ne, %1, %c0_i32_0 : i32
    scf.if %2 {
      %cst_8 = arith.constant 0.000000e+00 : f32
      %10 = vector.broadcast %cst_8 : f32 to vector<128x128xf32>
      %c0_9 = arith.constant 0 : index
      %c0_10 = arith.constant 0 : index
      %11 = vector.load %arg4[%c0_9, %c0_10] : memref<128x128xf32, #tpu.memory_space<vmem>>, vector<128x128xf32>
      tpu.vector_store %arg4[%c0_9, %c0_10], %10 {strides = array<i32>} : memref<128x128xf32, #tpu.memory_space<vmem>>, vector<128x128xf32>,
    } else {
    }
    %c0 = arith.constant 0 : index
    %c0_1 = arith.constant 0 : index
    %3 = vector.load %arg4[%c0, %c0_1] : memref<128x128xf32, #tpu.memory_space<vmem>>, vector<128x128xf32>
    %c0_2 = arith.constant 0 : index
    %c0_3 = arith.constant 0 : index
    %4 = vector.load %arg2[%c0_2, %c0_3] : memref<128x128xi8, #tpu.memory_space<vmem>>, vector<128x128xi8>
    %5 = arith.sitofp %4 : vector<128x128xi8> to vector<128x128xbf16>
    %c0_4 = arith.constant 0 : index
    %c0_5 = arith.constant 0 : index
    %6 = vector.load %arg3[%c0_4, %c0_5] : memref<128x128xbf16, #tpu.memory_space<vmem>>, vector<128x128xbf16>
    %cst = arith.constant dense<0.000000e+00> : vector<128x128xf32>
    %7 = tpu.matmul %5, %6, %cst {dimension_numbers = #tpu.dot_dimension_numbers<[1], [0], [0], [1], [0, 0, 1, 1], [], []>} : vector<128x128xbf16>, vector<128x128xbf16>, vector<128x128xf32> -> vector<128x128xf32>
    %8 = arith.addf %3, %7 : vector<128x128xf32>
    %c0_6 = arith.constant 0 : index
    %c0_7 = arith.constant 0 : index
    %9 = vector.load %arg4[%c0_6, %c0_7] : memref<128x128xf32, #tpu.memory_space<vmem>>, vector<128x128xf32>
    tpu.vector_store %arg4[%c0_6, %c0_7], %8 {strides = array<i32>} : memref<128x128xf32, #tpu.memory_space<vmem>>, vector<128x128xf32>,
    return
  }
  func.func @transform_0(%arg0: i32, %arg1: i32) -> (i32, i32) {
    %c0_i32 = arith.constant 0 : i32
    return %arg0, %arg1 : i32, i32
  }
  func.func @transform_1(%arg0: i32, %arg1: i32) -> (i32, i32) {
    %c0_i32 = arith.constant 0 : i32
    %c0_i32_0 = arith.constant 0 : i32
    return %arg1, %c0_i32 : i32, i32
  }
  func.func @transform_2(%arg0: i32, %arg1: i32) -> (i32, i32) {
    %c0_i32 = arith.constant 0 : i32
    %c0_i32_0 = arith.constant 0 : i32
    return %arg0, %c0_i32 : i32, i32
  }
}

</mosaic_0001>

<bundles_post_ra>
// kernel: graph_conv_layer.1
= control target key start
LH: loop header
LB: loop body
LE: loop exit
PB: predicated region body
PF: predicated region fallthrough
CT: control target
= control target key end

     0   :  { %s437_s1 = inlined_call_operand.vmem [shape: bf16[128,128], index: 1, kind: input, shape index: {}]   ;;  %s438_s0 = inlined_call_operand.vmem [shape: s8[128,128], index: 0, kind: input, shape index: {}]   ;;  %s439_s2 = inlined_call_operand.vmem [shape: f32[128,128], index: 2, kind: output, shape index: {}]  }
   0x1   :  { %v330_v0 = vld [vmem:[%s437_s1] sm:$0xff]   ;;  %v331_v1 = vld [vmem:[%s437_s1 + $0x8] sm:$0xff]   ;;  %v332_v2 = vld [vmem:[%s437_s1 + $0x10] sm:$0xff]  }
   0x2   :  { %281 = vmatprep.subr.bf16.mxu0 %v330_v0  ;;  %313 = vmatprep.subr.bf16.mxu1 %v330_v0  ;;  %v333_v3 = vld [vmem:[%s437_s1 + $0x18] sm:$0xff]   ;;  %v48_v4 = vld [vmem:[%s438_s0] sm:$0xff]  ;;  %v50_v5 = vld [vmem:[%s438_s0 + $0x10] sm:$0xff] }
   0x3   :  { %282 = vmatpush3.bf16.msra.mxu0 %v330_v0  ;;  %321 = vmatpush3.bf16.msra.mxu1 %v330_v0  ;;  %v52_v6 = vunpack.c.l.s8.bf16 %v48_v4  ;;  %v56_v7 = vunpack.c.l.s8.bf16 %v50_v5  ;;  %v334_v8 = vld [vmem:[%s437_s1 + $0x20] sm:$0xff]   ;;  %v335_v9 = vld [vmem:[%s437_s1 + $0x28] sm:$0xff]   ;;  %v336_v10 = vld [vmem:[%s437_s1 + $0x30] sm:$0xff]   ;;  %v53_v14 = vunpack.c.h.s8.bf16 %v48_v4  ;;  %v57_v15 = vunpack.c.h.s8.bf16 %v50_v5 }
   0x4   :  { %283 = vmatprep.subr.bf16.mxu0 %v331_v1  ;;  %314 = vmatprep.subr.bf16.mxu1 %v331_v1  ;;  %v337_v11 = vld [vmem:[%s437_s1 + $0x38] sm:$0xff]   ;;  %v49_v12 = vld [vmem:[%s438_s0 + $0x8] sm:$0xff] }
   0x5   :  { %297 = vmatprep.mubr.bf16.mxu0 %v52_v6  ;;  %305 = vmatprep.mubr.bf16.mxu1 %v56_v7  ;;  %v51_v13 = vld [vmem:[%s438_s0 + $0x18] sm:$0xff]  ;;  %v54_v16 = vunpack.c.l.s8.bf16 %v49_v12  ;;  %v55_v18 = vunpack.c.h.s8.bf16 %v49_v12 }
   0x6   :  { %v58_v17 = vunpack.c.l.s8.bf16 %v51_v13  ;;  %v59_v19 = vunpack.c.h.s8.bf16 %v51_v13 }
   0x7   :  { %284 = vmatpush3.bf16.msra.mxu0 %v331_v1  ;;  %322 = vmatpush3.bf16.msra.mxu1 %v331_v1 }
   0x8   :  { %285 = vmatprep.subr.bf16.mxu0 %v332_v2  ;;  %315 = vmatprep.subr.bf16.mxu1 %v332_v2 }
   0xb   :  { %286 = vmatpush3.bf16.msra.mxu0 %v332_v2  ;;  %323 = vmatpush3.bf16.msra.mxu1 %v332_v2 }
   0xc   :  { %287 = vmatprep.subr.bf16.mxu0 %v333_v3  ;;  %316 = vmatprep.subr.bf16.mxu1 %v333_v3 }
   0xf   :  { %288 = vmatpush3.bf16.msra.mxu0 %v333_v3  ;;  %324 = vmatpush3.bf16.msra.mxu1 %v333_v3 }
  0x10   :  { %289 = vmatprep.subr.bf16.mxu0 %v334_v8  ;;  %317 = vmatprep.subr.bf16.mxu1 %v334_v8 }
  0x13   :  { %290 = vmatpush3.bf16.msra.mxu0 %v334_v8  ;;  %325 = vmatpush3.bf16.msra.mxu1 %v334_v8 }
  0x14   :  { %291 = vmatprep.subr.bf16.mxu0 %v335_v9  ;;  %318 = vmatprep.subr.bf16.mxu1 %v335_v9 }
  0x17   :  { %292 = vmatpush3.bf16.msra.mxu0 %v335_v9  ;;  %326 = vmatpush3.bf16.msra.mxu1 %v335_v9 }
  0x18   :  { %293 = vmatprep.subr.bf16.mxu0 %v336_v10  ;;  %319 = vmatprep.subr.bf16.mxu1 %v336_v10 }
  0x1b   :  { %294 = vmatpush3.bf16.msra.mxu0 %v336_v10  ;;  %327 = vmatpush3.bf16.msra.mxu1 %v336_v10 }
  0x1c   :  { %295 = vmatprep.subr.bf16.mxu0 %v337_v11  ;;  %320 = vmatprep.subr.bf16.mxu1 %v337_v11 }
  0x1f   :  { %296 = vmatpush3.bf16.msra.mxu0 %v337_v11  ;;  %328 = vmatpush3.bf16.msra.mxu1 %v337_v11 }
  0x22   :  { %298 = vmatmul.mubr.bf16.vlgmr.msra.gmra.mrb[0].mxu0 %v53_v14  ;;  %306 = vmatmul.mubr.bf16.vlgmr.msra.gmra.mrb[0].mxu1 %v57_v15 }
  0x23   :  { %301 = vmatprep.mubr.bf16.mxu0 %v54_v16  ;;  %309 = vmatprep.mubr.bf16.mxu1 %v58_v17 }
  0x2a   :  { %302 = vmatmul.mubr.bf16.gmra.mrb[4].mxu0 %v55_v18  ;;  %310 = vmatmul.mubr.bf16.gmra.mrb[4].mxu1 %v59_v19 }
  0xf5   :  { %v299_v20 = vpop.f32.mrb[0].mxu0  ;;  %v307_v21 = vpop.f32.mrb[0].mxu1 }
  0xf6   :  { %v158_v22 = vpop.f32.mrb[1].mxu0  ;;  %v190_v23 = vpop.f32.mrb[1].mxu1  ;;  %239 = vst [vmem:[%s439_s2 + $0x10] sm:$0xff] %v299_v20  ;;  %247 = vst [vmem:[%s439_s2 + $0x50] sm:$0xff] %v307_v21 }
  0xf7   :  { %v300_v24 = vpop.f32.mrb[2].mxu0  ;;  %v308_v25 = vpop.f32.mrb[2].mxu1  ;;  %237 = vst [vmem:[%s439_s2] sm:$0xff] %v158_v22  ;;  %245 = vst [vmem:[%s439_s2 + $0x40] sm:$0xff] %v190_v23 }
  0xf8   :  { %v161_v26 = vpop.f32.mrb[3].mxu0  ;;  %v193_v27 = vpop.f32.mrb[3].mxu1  ;;  %240 = vst [vmem:[%s439_s2 + $0x18] sm:$0xff] %v300_v24  ;;  %248 = vst [vmem:[%s439_s2 + $0x58] sm:$0xff] %v308_v25 }
  0xf9   :  { %238 = vst [vmem:[%s439_s2 + $0x8] sm:$0xff] %v161_v26  ;;  %246 = vst [vmem:[%s439_s2 + $0x48] sm:$0xff] %v193_v27 }
  0xfd   :  { %v303_v28 = vpop.f32.mrb[4].mxu0  ;;  %v311_v29 = vpop.f32.mrb[4].mxu1 }
  0xfe   :  { %v174_v30 = vpop.f32.mrb[5].mxu0  ;;  %v206_v31 = vpop.f32.mrb[5].mxu1  ;;  %243 = vst [vmem:[%s439_s2 + $0x30] sm:$0xff] %v303_v28  ;;  %251 = vst [vmem:[%s439_s2 + $0x70] sm:$0xff] %v311_v29 }
  0xff   :  { %v304_v32 = vpop.f32.mrb[6].mxu0  ;;  %v312_v33 = vpop.f32.mrb[6].mxu1  ;;  %241 = vst [vmem:[%s439_s2 + $0x20] sm:$0xff] %v174_v30  ;;  %249 = vst [vmem:[%s439_s2 + $0x60] sm:$0xff] %v206_v31 }
 0x100   :  { %v177_v34 = vpop.f32.mrb[7].mxu0  ;;  %v209_v35 = vpop.f32.mrb[7].mxu1  ;;  %244 = vst [vmem:[%s439_s2 + $0x38] sm:$0xff] %v304_v32  ;;  %252 = vst [vmem:[%s439_s2 + $0x78] sm:$0xff] %v312_v33 }
 0x101   :  { %242 = vst [vmem:[%s439_s2 + $0x28] sm:$0xff] %v177_v34  ;;  %250 = vst [vmem:[%s439_s2 + $0x68] sm:$0xff] %v209_v35 }

</bundles_post_ra>
